<compile_context>
chip_gen: v7x
topology: tpu7x:2x2x1
jax: 0.10.0
libtpu: 0.0.40
codegen_flags: <defaults>
</compile_context>

<pallas_src>
import re

import jax
import jax.numpy as jnp
from jax.experimental import pallas as pl
from jax.experimental.pallas import tpu as pltpu

_MiB = 1024 * 1024
_VMEM_LIMIT_BYTES = 32 * _MiB  # safe on every generation (>= default scoped, <= physical)


def _tpu_generation():
    """Best-effort TPU generation (e.g. 5, 6, 7). Returns 0 if unknown."""
    try:
        kind = jax.devices()[0].device_kind.lower()  # "tpu v5e", "tpu v6e", "tpu7x", ...
    except Exception:
        return 0
    m = re.search(r"(\d+)", kind)
    return int(m.group(1)) if m else 0


def _make_silu_kernel(compute_dtype):
    def kernel(x_ref, o_ref):
        x = x_ref[...].astype(compute_dtype)
        # One transcendental per element: sigmoid(x) = 0.5 * (tanh(0.5*x) + 1).
        # (jax.nn.sigmoid lowers to exp + divide = 2 EUP ops/elem, which can make
        # the EUP slot the binding unit on v7x / bf16-on-v6e.)
        y = x * (0.5 * (jnp.tanh(0.5 * x) + 1.0))
        o_ref[...] = y.astype(o_ref.dtype)

    return kernel


def _round_up(a, m):
    return ((a + m - 1) // m) * m


def _round_down(a, m):
    return (a // m) * m


def _swish_2d(x2d, *, compute_dtype, target_block_bytes, two_tensorcores):
    """Core pallas_call over a lane-dense (rows, lane) slab, lane % 128 == 0."""
    rows, lane = x2d.shape
    dtype = x2d.dtype
    itemsize = jnp.dtype(dtype).itemsize
    # Minimum sublane multiple for the (sublane, 128) tiling constraint.
    sublane = {4: 8, 2: 16, 1: 32}.get(itemsize, 8)

    # Rows per block targeting ~target_block_bytes (4 copies double-buffered
    # in+out stay well inside the explicit VMEM limit on every generation).
    tile_rows = max(sublane, _round_down(target_block_bytes // (lane * itemsize), sublane))
    if tile_rows >= rows:
        if two_tensorcores and rows > 2 * sublane:
            # Keep >= 2 grid blocks only where there are 2 TensorCores (v7x).
            tile_rows = _round_up(pl.cdiv(rows, 2), sublane)
        else:
            # Single full-extent block (legal even if rows % sublane != 0); no
            # extra grid-step overhead on single-TC chips (v5e/v6e).
            tile_rows = rows
    grid = (pl.cdiv(rows, tile_rows),)
    n = rows * lane

    return pl.pallas_call(
        _make_silu_kernel(compute_dtype),
        out_shape=jax.ShapeDtypeStruct((rows, lane), dtype),
        grid_spec=pltpu.PrefetchScalarGridSpec(
            num_scalar_prefetch=0,
            grid=grid,
            in_specs=[pl.BlockSpec((tile_rows, lane), lambda i: (i, 0))],
            out_specs=pl.BlockSpec((tile_rows, lane), lambda i: (i, 0)),
        ),
        compiler_params=pltpu.CompilerParams(
            dimension_semantics=("parallel",),
            vmem_limit_bytes=_VMEM_LIMIT_BYTES,
        ),
        cost_estimate=pl.CostEstimate(
            flops=3 * n,
            transcendentals=n,  # one tanh per element
            bytes_accessed=2 * n * itemsize,
        ),
    )(x2d)


def swish(x, *, target_block_bytes=None):
    """Elementwise SiLU via Pallas. Accepts any shape; internally flattens."""
    orig_shape = x.shape
    orig_dtype = x.dtype
    n = x.size
    if n == 0:
        return x

    gen = _tpu_generation()
    two_tensorcores = gen >= 7
    if target_block_bytes is None:
        # Bigger blocks on v7x (higher HBM BW -> per-grid-step overhead matters
        # more); 2 MiB is already past the roofline knee on v5e/v6e.
        target_block_bytes = 4 * _MiB if gen >= 7 else 2 * _MiB

    # bf16 compute only on chips with a bf16 VPU/EUP (v6e+); f32 otherwise.
    if orig_dtype == jnp.bfloat16 and gen >= 6:
        compute_dtype = jnp.bfloat16
    else:
        compute_dtype = jnp.float32

    x_flat = jnp.ravel(x)  # free bitcast for a contiguous array

    # Fast path: widest lane (multiple of 128) that divides n -> free reshape,
    # no pad, no slice. Covers essentially all NN activation shapes.
    for cand in (1024, 512, 256, 128):
        if n % cand == 0:
            y2d = _swish_2d(
                x_flat.reshape(n // cand, cand),
                compute_dtype=compute_dtype,
                target_block_bytes=target_block_bytes,
                two_tensorcores=two_tensorcores,
            )
            return y2d.reshape(orig_shape)

    # Ragged element count (n % 128 != 0, rare): run the kernel over the widest
    # lane-aligned prefix and compute the small (< lane) tail with a tiny fused
    # XLA op, instead of padding + slicing the full tensor through HBM.
    lane = 1024 if n >= 1024 else 128
    n_main = _round_down(n, lane)
    tail = x_flat[n_main:].astype(jnp.float32)
    y_tail = (tail * jax.nn.sigmoid(tail)).astype(orig_dtype)
    if n_main == 0:
        # Fewer than 128 elements: not worth a kernel launch.
        return y_tail.reshape(orig_shape)
    y_main = _swish_2d(
        x_flat[:n_main].reshape(n_main // lane, lane),
        compute_dtype=compute_dtype,
        target_block_bytes=target_block_bytes,
        two_tensorcores=two_tensorcores,
    )
    y_flat = jnp.concatenate([y_main.reshape(-1), y_tail])
    return y_flat.reshape(orig_shape)


if __name__ == "__main__":
    key = jax.random.PRNGKey(0)
    # NCHW activation-like input, consistent with the TCN module's usage.
    x = jax.random.normal(key, (2, 4, 16, 16), dtype=jnp.float32)

    y = swish(x)
    jax.block_until_ready(y)
    y_ref = x * jax.nn.sigmoid(x)
    assert y.shape == x.shape and y.dtype == x.dtype
    assert jnp.allclose(y, y_ref, atol=1e-5, rtol=1e-5)

    # Ragged element count (exercises the no-pad prefix + tail path).
    x2 = jax.random.normal(jax.random.PRNGKey(1), (5, 7, 31), dtype=jnp.float32)
    y2 = swish(x2)
    jax.block_until_ready(y2)
    y2_ref = x2 * jax.nn.sigmoid(x2)
    assert y2.shape == x2.shape and y2.dtype == x2.dtype
    assert jnp.allclose(y2, y2_ref, atol=1e-5, rtol=1e-5)

    # bf16 input (bf16 compute on v6e+/v7x, f32 compute on v5e).
    x3 = jax.random.normal(jax.random.PRNGKey(2), (4, 8, 64), dtype=jnp.bfloat16)
    y3 = swish(x3)
    jax.block_until_ready(y3)
    x3_f32 = x3.astype(jnp.float32)
    y3_ref = (x3_f32 * jax.nn.sigmoid(x3_f32)).astype(jnp.bfloat16)
    assert y3.dtype == jnp.bfloat16
    assert jnp.allclose(
        y3.astype(jnp.float32), y3_ref.astype(jnp.float32), atol=5e-2, rtol=5e-2
    )

    print("KERNEL_OK")
</pallas_src>

<mosaic_0001>
module attributes {stable_mosaic.version = 11 : i64} {
  func.func @kernel(%arg0: i32, %arg1: memref<2x1024xf32, #tpu.memory_space<vmem>>, %arg2: memref<2x1024xf32, #tpu.memory_space<vmem>>) attributes {dimension_semantics = [#tpu.dimension_semantics<parallel>], iteration_bounds = array<i64: 1>, scalar_prefetch = 0 : i64, scratch_operands = 0 : i64, tpu.core_type = #tpu.core_type<tc>, window_params = [{transform_indices = @transform_0, window_bounds = array<i64: 2, 1024>}, {transform_indices = @transform_1, window_bounds = array<i64: 2, 1024>}]} {
    %c0 = arith.constant 0 : index
    %c0_0 = arith.constant 0 : index
    %0 = vector.load %arg1[%c0, %c0_0] : memref<2x1024xf32, #tpu.memory_space<vmem>>, vector<2x1024xf32>
    %cst = arith.constant 5.000000e-01 : f32
    %1 = vector.broadcast %cst : f32 to vector<2x1024xf32>
    %2 = arith.mulf %1, %0 : vector<2x1024xf32>
    %3 = math.tanh %2 : vector<2x1024xf32>
    %cst_1 = arith.constant 1.000000e+00 : f32
    %4 = vector.broadcast %cst_1 : f32 to vector<2x1024xf32>
    %5 = arith.addf %3, %4 : vector<2x1024xf32>
    %cst_2 = arith.constant 5.000000e-01 : f32
    %6 = vector.broadcast %cst_2 : f32 to vector<2x1024xf32>
    %7 = arith.mulf %6, %5 : vector<2x1024xf32>
    %8 = arith.mulf %0, %7 : vector<2x1024xf32>
    %c0_3 = arith.constant 0 : index
    %c0_4 = arith.constant 0 : index
    %9 = vector.load %arg2[%c0_3, %c0_4] : memref<2x1024xf32, #tpu.memory_space<vmem>>, vector<2x1024xf32>
    tpu.vector_store %arg2[%c0_3, %c0_4], %8 {strides = array<i32>} : memref<2x1024xf32, #tpu.memory_space<vmem>>, vector<2x1024xf32>,
    return
  }
  func.func @transform_0(%arg0: i32) -> (i32, i32) {
    %c0_i32 = arith.constant 0 : i32
    %c0_i32_0 = arith.constant 0 : i32
    return %arg0, %c0_i32 : i32, i32
  }
  func.func @transform_1(%arg0: i32) -> (i32, i32) {
    %c0_i32 = arith.constant 0 : i32
    %c0_i32_0 = arith.constant 0 : i32
    return %arg0, %c0_i32 : i32, i32
  }
}

</mosaic_0001>

<bundles_post_ra>
// kernel: tpu_custom_call.1
= control target key start
LH: loop header
LB: loop body
LE: loop exit
PB: predicated region body
PF: predicated region fallthrough
CT: control target
= control target key end

     0   :  { %6 = vsyncpa [#allocation3], 0  ;;  %s140_s0 = inlined_call_operand.hbm [shape: f32[2,1024], index: 0, kind: input, shape index: {}]   ;;  %s141_s1 = inlined_call_operand.hbm [shape: f32[2,1024], index: 1, kind: output, shape index: {}]  }
   0x1   :  { %7 = vsyncpa [#allocation4], 0  ;;  %s104_s6 = smov [#allocation2]   ;;  %s56_s10 = scalar_lea.hbm %s140_s0, 256 }
   0x2   :  { %s14_s7 = sshll.u32 %s104_s6, 4  ;;  %p57_p0 = scmp.ne.s32.totalorder %s140_s0, %s56_s10  ;;  %s15_s7 = int_to_ptr.vmem [resolvable:$true] %s14_s7 }
   0x3   :  { %p60_p1 = scmp.lt.u32.totalorder %s56_s10, %s140_s0 }
   0x5   :  { %p62_p2 = pnand %p60_p1, %p57_p0 }
   0x7   :  { %65 = shalt.err (!%p62_p2)
}
   0x8   :  { %s66_s15 = scalar_lea.vmem %s15_s7, 256  ;;  %p71_p4 = scmp.lt.s32.totalorder %s15_s7, %s15_s7 }
   0x9   :  { %p67_p3 = scmp.ne.s32.totalorder %s15_s7, %s66_s15  ;;  %p72_p5 = scmp.lt.s32.totalorder %s66_s15, %s66_s15 }
   0xb   :  { %p73_p6 = por %p72_p5, %p71_p4 }
   0xd   :  { %p74_p7 = pnand %p73_p6, %p67_p3 }
   0xf   :  { %77 = shalt.err (!%p74_p7)
}
  0x10   :  { %17 = dma.hbm_to_vmem [thread:$0]  %s140_s0, 256, %s15_s7, [#allocation3]  }
  0x11   :  { %100 = dma.done.wait [#allocation3], 256  }
  0x12   :  { %101 = vsyncadd [#allocation3], 4294967040  ;;  %v21_v0 = vld [vmem:[#allocation2] sm:$0xff]  ;;  %v22_v1 = vld [vmem:[#allocation2 + $0x8] sm:$0xff]  ;;  %s105_s18 = smov [#allocation5]  }
  0x13   :  { %v23_v2 = vmul.f32 0.5, %v21_v0  ;;  %v24_v3 = vmul.f32 0.5, %v22_v1  ;;  %s41_s19 = sshll.u32 %s105_s18, 4  ;;  %s42_s19 = int_to_ptr.vmem [resolvable:$true] %s41_s19 }
  0x14   :  { %s78_s0 = scalar_lea.vmem %s42_s19, 256  ;;  %p83_p9 = scmp.lt.s32.totalorder %s42_s19, %s42_s19 }
  0x15   :  { %52 = vtanh.f32 %v23_v2  ;;  %p79_p8 = scmp.ne.s32.totalorder %s42_s19, %s78_s0  ;;  %p84_p10 = scmp.lt.s32.totalorder %s78_s0, %s78_s0 }
  0x16   :  { %54 = vtanh.f32 %v24_v3 }
  0x17   :  { %p85_p11 = por %p84_p10, %p83_p9 }
  0x19   :  { %p86_p12 = pnand %p85_p11, %p79_p8 }
  0x1f   :  { %v53_v4 = vpop.eup %52 }
  0x20   :  { %v55_v5 = vpop.eup %54  ;;  %v27_v6 = vadd.f32 1.0, %v53_v4 }
  0x21   :  { %v28_v7 = vadd.f32 1.0, %v55_v5 }
  0x22   :  { %v29_v8 = vmul.f32 0.5, %v27_v6 }
  0x23   :  { %v30_v9 = vmul.f32 0.5, %v28_v7 }
  0x24   :  { %v31_v10 = vmul.f32 %v29_v8, %v21_v0 }
  0x25   :  { %v32_v11 = vmul.f32 %v30_v9, %v22_v1 }
  0x26   :  { %33 = vst [vmem:[#allocation5] sm:$0xff] %v31_v10 }
  0x27   :  { %34 = vst [vmem:[#allocation5 + $0x8] sm:$0xff] %v32_v11 }
  0x28   :  { %89 = shalt.err (!%p86_p12)
}
  0x29   :  { %s90_s22 = scalar_lea.hbm %s141_s1, 256 }
  0x2a   :  { %p91_p13 = scmp.ne.s32.totalorder %s141_s1, %s90_s22  ;;  %p94_p0 = scmp.lt.u32.totalorder %s90_s22, %s141_s1 }
  0x2c   :  { %p96_p1 = pnand %p94_p0, %p91_p13 }
  0x2e   :  { %99 = shalt.err (!%p96_p1)
}
  0x2f   :  { %44 = dma.vmem_to_hbm [thread:$0]  %s42_s19, 256, %s141_s1, [#allocation4]  }
  0x30   :  { %102 = dma.done.wait [#allocation4], 256  }
  0x31   :  { %103 = vsyncadd [#allocation4], 4294967040 }
  0x32   :  { %48 = vsyncpa [#allocation3], 1 }
  0x33   :  { %49 = vsyncpa [#allocation4], 1 }

</bundles_post_ra>
